<compile_context>
chip_gen: v6e
topology: v6e:2x2x1
jax: 0.10.0
libtpu: 0.0.40
codegen_flags: <defaults>
</compile_context>

<pallas_src>
import functools

import jax
import jax.numpy as jnp
from jax.experimental import pallas as pl
from jax.experimental.pallas import tpu as pltpu

LANE = 128      # TPU lane width (last-dim tile)
SUBLANE = 8     # f32 sublane width (second-to-last-dim tile)


def _round_up(x, m):
    return ((x + m - 1) // m) * m


def _cdiv(a, b):
    return -(-a // b)


def _fused_mlp_kernel(x_ref, w0_ref, b0_ref, wh_ref, bh_ref, wo_ref, bo_ref,
                      o_ref, *, hidden_layer):
    """Entire MLP in one kernel invocation; layer loop statically unrolled.

    All parameters are VMEM-resident for the whole call; intermediates live in
    vregs / VMEM scratch and never touch HBM.
    """
    h = jnp.dot(x_ref[...], w0_ref[...],
                preferred_element_type=jnp.float32) + b0_ref[...]
    for i in range(hidden_layer):      # static unroll
        h = jnp.dot(h, wh_ref[i], preferred_element_type=jnp.float32) + bh_ref[i]
        h = jnp.maximum(h, 0.0)        # ReLU on the VPU (free under DMA slack)
    y = jnp.dot(h, wo_ref[...], preferred_element_type=jnp.float32) + bo_ref[...]
    o_ref[...] = y.astype(o_ref.dtype)


def init_params(key, input_size, hidden_size, hidden_layer, output_size):
    """Deterministic init mimicking nn.Linear default (uniform +-1/sqrt(fan_in)).

    Weights are kept as [in_features, out_features] (transpose of PyTorch).
    """
    params = []

    def make_linear(k, din, dout):
        kw, kb = jax.random.split(k)
        bound = 1.0 / jnp.sqrt(din)
        w = jax.random.uniform(kw, (din, dout), jnp.float32, -bound, bound)
        b = jax.random.uniform(kb, (dout,), jnp.float32, -bound, bound)
        return w, b

    keys = jax.random.split(key, hidden_layer + 2)
    params.append(make_linear(keys[0], input_size, hidden_size))   # hidden_0
    for i in range(hidden_layer):                                  # self.ly
        params.append(make_linear(keys[1 + i], hidden_size, hidden_size))
    params.append(make_linear(keys[-1], hidden_size, output_size))  # self.out
    return params


def pad_params_for_tpu(params, input_size, hidden_size, hidden_layer, output_size):
    """One-time host-side packing of parameters.

    Only the HIDDEN feature dim is zero-padded to the 128-lane width (weights are
    tiny and VMEM-resident, and padded hidden lanes stay exactly zero through the
    network).  The input feature dim (w0 rows) and the output feature dim (wo cols,
    bo) are kept at their natural sizes so the big HBM streams (x in, y out) are
    not inflated.
    """
    dh_p = _round_up(hidden_size, LANE)

    w0, b0 = params[0]
    w0_p = jnp.zeros((input_size, dh_p), jnp.float32).at[:, :hidden_size].set(w0)
    b0_p = jnp.zeros((1, dh_p), jnp.float32).at[0, :hidden_size].set(b0)

    n_hidden = max(hidden_layer, 1)   # keep a non-empty (unused) stack if L == 0
    wh_p = jnp.zeros((n_hidden, dh_p, dh_p), jnp.float32)
    bh_p = jnp.zeros((n_hidden, 1, dh_p), jnp.float32)
    for i in range(hidden_layer):
        wi, bi = params[1 + i]
        wh_p = wh_p.at[i, :hidden_size, :hidden_size].set(wi)
        bh_p = bh_p.at[i, 0, :hidden_size].set(bi)

    wo, bo = params[-1]
    wo_p = jnp.zeros((dh_p, output_size), jnp.float32).at[:hidden_size, :].set(wo)
    bo_p = bo.reshape(1, output_size).astype(jnp.float32)

    return dict(w0=w0_p, b0=b0_p, wh=wh_p, bh=bh_p, wo=wo_p, bo=bo_p)


def fk_model_back_forward(x, padded, hidden_layer, output_size, *,
                          max_batch_tile=2048, min_grid_steps=2,
                          small_batch_threshold=256):
    """Replicates fk_model_back.forward with a single fused Pallas kernel call."""
    B, Din = x.shape

    kernel = functools.partial(_fused_mlp_kernel, hidden_layer=hidden_layer)
    weights = (padded["w0"], padded["b0"], padded["wh"], padded["bh"],
               padded["wo"], padded["bo"])

    if B <= small_batch_threshold:
        # Grid-less single-block call: no pipeline step, no host pad/slice at all.
        vmem = pl.BlockSpec(memory_space=pltpu.MemorySpace.VMEM)
        return pl.pallas_call(
            kernel,
            out_shape=jax.ShapeDtypeStruct((B, output_size), jnp.float32),
            in_specs=[vmem] * 7,
            out_specs=vmem,
        )(x, *weights)

    # Large batch: tile batch as a "parallel" grid axis (megacore / v7x 2-TC).
    # Adaptive tile: >= min_grid_steps steps (both TCs busy on v7x), tile capped at
    # max_batch_tile rows, batch padding waste bounded by SUBLANE*steps rows.
    max_tile = max(_round_up(max_batch_tile, SUBLANE), SUBLANE)
    steps = max(min_grid_steps, _cdiv(B, max_tile))
    batch_tile = _round_up(_cdiv(B, steps), SUBLANE)
    b_pad = batch_tile * steps
    x_p = x if b_pad == B else jnp.pad(x, ((0, b_pad - B), (0, 0)))

    # Weight index_maps return block 0 => weights stay VMEM-resident across steps
    # (fetched once, never re-DMA'd).  Input/output blocks use the NATURAL feature
    # widths (block last dim == full array dim), so only live lanes hit HBM.
    in_specs = [
        pl.BlockSpec((batch_tile, Din), lambda i: (i, 0)),
        pl.BlockSpec(padded["w0"].shape, lambda i: (0, 0)),
        pl.BlockSpec(padded["b0"].shape, lambda i: (0, 0)),
        pl.BlockSpec(padded["wh"].shape, lambda i: (0, 0, 0)),
        pl.BlockSpec(padded["bh"].shape, lambda i: (0, 0, 0)),
        pl.BlockSpec(padded["wo"].shape, lambda i: (0, 0)),
        pl.BlockSpec(padded["bo"].shape, lambda i: (0, 0)),
    ]
    out = pl.pallas_call(
        kernel,
        out_shape=jax.ShapeDtypeStruct((b_pad, output_size), jnp.float32),
        grid=(steps,),
        in_specs=in_specs,
        out_specs=pl.BlockSpec((batch_tile, output_size), lambda i: (i, 0)),
        compiler_params=pltpu.CompilerParams(
            dimension_semantics=("parallel",)),
    )(x_p, *weights)

    return out if b_pad == B else out[:B]


if __name__ == "__main__":
    input_size, hidden_size, hidden_layer, output_size = 16, 32, 2, 4
    batch = 8

    key = jax.random.PRNGKey(0)
    key_x, key_p = jax.random.split(key)
    x = jax.random.normal(key_x, (batch, input_size), jnp.float32)
    params = init_params(key_p, input_size, hidden_size, hidden_layer,
                         output_size)
    padded = pad_params_for_tpu(params, input_size, hidden_size, hidden_layer,
                                output_size)

    def ref_forward(xx):  # plain-JAX reference (same math, no Pallas)
        r = xx @ params[0][0] + params[0][1]        # NOTE: no ReLU after hidden_0,
        for i in range(hidden_layer):               # matching the PyTorch module.
            r = jnp.maximum(r @ params[1 + i][0] + params[1 + i][1], 0.0)
        return r @ params[-1][0] + params[-1][1]

    # jit the whole wrapper so any residual pad/slice lives in the same dispatch
    # as the pallas_call (one XLA executable per shape/config).
    fwd = jax.jit(
        fk_model_back_forward,
        static_argnames=("hidden_layer", "output_size", "max_batch_tile",
                         "min_grid_steps", "small_batch_threshold"))

    # Small batch: grid-less fused call, no host-side padding or slicing at all.
    y = fwd(x, padded, hidden_layer=hidden_layer, output_size=output_size)
    jax.block_until_ready(y)
    assert y.shape == (batch, output_size)
    assert jnp.allclose(y, ref_forward(x), atol=1e-4, rtol=1e-4)

    # Larger, non-tile-multiple batch: forces the batch-parallel grid path with
    # >= 2 steps (v7x megacore) and a zero-padded final row block.
    x_big = jax.random.normal(jax.random.PRNGKey(1), (20, input_size), jnp.float32)
    y_big = fwd(x_big, padded, hidden_layer=hidden_layer, output_size=output_size,
                max_batch_tile=8, small_batch_threshold=0)
    jax.block_until_ready(y_big)
    assert y_big.shape == (20, output_size)
    assert jnp.allclose(y_big, ref_forward(x_big), atol=1e-4, rtol=1e-4)

    print("KERNEL_OK")
</pallas_src>

<mosaic_0001>
module attributes {stable_mosaic.version = 11 : i64} {
  func.func @_fused_mlp_kernel(%arg0: memref<8x16xf32, #tpu.memory_space<vmem>>, %arg1: memref<16x128xf32, #tpu.memory_space<vmem>>, %arg2: memref<1x128xf32, #tpu.memory_space<vmem>>, %arg3: memref<2x128x128xf32, #tpu.memory_space<vmem>>, %arg4: memref<2x1x128xf32, #tpu.memory_space<vmem>>, %arg5: memref<128x4xf32, #tpu.memory_space<vmem>>, %arg6: memref<1x4xf32, #tpu.memory_space<vmem>>, %arg7: memref<8x4xf32, #tpu.memory_space<vmem>>) attributes {dimension_semantics = [], scalar_prefetch = 0 : i64, scratch_operands = 0 : i64, tpu.core_type = #tpu.core_type<tc>} {
    %c0 = arith.constant 0 : index
    %c0_0 = arith.constant 0 : index
    %0 = vector.load %arg0[%c0, %c0_0] : memref<8x16xf32, #tpu.memory_space<vmem>>, vector<8x16xf32>
    %c0_1 = arith.constant 0 : index
    %c0_2 = arith.constant 0 : index
    %1 = vector.load %arg1[%c0_1, %c0_2] : memref<16x128xf32, #tpu.memory_space<vmem>>, vector<16x128xf32>
    %cst = arith.constant dense<0.000000e+00> : vector<8x128xf32>
    %2 = tpu.matmul %0, %1, %cst {dimension_numbers = #tpu.dot_dimension_numbers<[1], [0], [0], [1], [0, 0, 1, 1], [], []>} : vector<8x16xf32>, vector<16x128xf32>, vector<8x128xf32> -> vector<8x128xf32>
    %c0_3 = arith.constant 0 : index
    %c0_4 = arith.constant 0 : index
    %3 = vector.load %arg2[%c0_3, %c0_4] : memref<1x128xf32, #tpu.memory_space<vmem>>, vector<1x128xf32>
    %4 = vector.broadcast %3 : vector<1x128xf32> to vector<8x128xf32>
    %5 = arith.addf %2, %4 : vector<8x128xf32>
    %c0_5 = arith.constant 0 : index
    %c0_6 = arith.constant 0 : index
    %c0_7 = arith.constant 0 : index
    %6 = vector.load %arg3[%c0_5, %c0_6, %c0_7] : memref<2x128x128xf32, #tpu.memory_space<vmem>>, vector<1x128x128xf32>
    %7 = vector.shape_cast %6 : vector<1x128x128xf32> to vector<128x128xf32>
    %cst_8 = arith.constant dense<0.000000e+00> : vector<8x128xf32>
    %8 = tpu.matmul %5, %7, %cst_8 {dimension_numbers = #tpu.dot_dimension_numbers<[1], [0], [0], [1], [0, 0, 1, 1], [], []>} : vector<8x128xf32>, vector<128x128xf32>, vector<8x128xf32> -> vector<8x128xf32>
    %c0_9 = arith.constant 0 : index
    %c0_10 = arith.constant 0 : index
    %c0_11 = arith.constant 0 : index
    %9 = vector.load %arg4[%c0_9, %c0_10, %c0_11] : memref<2x1x128xf32, #tpu.memory_space<vmem>>, vector<1x1x128xf32>
    %10 = vector.shape_cast %9 : vector<1x1x128xf32> to vector<1x128xf32>
    %11 = vector.broadcast %10 : vector<1x128xf32> to vector<8x128xf32>
    %12 = arith.addf %8, %11 : vector<8x128xf32>
    %cst_12 = arith.constant 0.000000e+00 : f32
    %13 = vector.broadcast %cst_12 : f32 to vector<8x128xf32>
    %14 = arith.maximumf %12, %13 : vector<8x128xf32>
    %c1 = arith.constant 1 : index
    %c0_13 = arith.constant 0 : index
    %c0_14 = arith.constant 0 : index
    %15 = vector.load %arg3[%c1, %c0_13, %c0_14] : memref<2x128x128xf32, #tpu.memory_space<vmem>>, vector<1x128x128xf32>
    %16 = vector.shape_cast %15 : vector<1x128x128xf32> to vector<128x128xf32>
    %cst_15 = arith.constant dense<0.000000e+00> : vector<8x128xf32>
    %17 = tpu.matmul %14, %16, %cst_15 {dimension_numbers = #tpu.dot_dimension_numbers<[1], [0], [0], [1], [0, 0, 1, 1], [], []>} : vector<8x128xf32>, vector<128x128xf32>, vector<8x128xf32> -> vector<8x128xf32>
    %c1_16 = arith.constant 1 : index
    %c0_17 = arith.constant 0 : index
    %c0_18 = arith.constant 0 : index
    %18 = vector.load %arg4[%c1_16, %c0_17, %c0_18] : memref<2x1x128xf32, #tpu.memory_space<vmem>>, vector<1x1x128xf32>
    %19 = vector.shape_cast %18 : vector<1x1x128xf32> to vector<1x128xf32>
    %20 = vector.broadcast %19 : vector<1x128xf32> to vector<8x128xf32>
    %21 = arith.addf %17, %20 : vector<8x128xf32>
    %cst_19 = arith.constant 0.000000e+00 : f32
    %22 = vector.broadcast %cst_19 : f32 to vector<8x128xf32>
    %23 = arith.maximumf %21, %22 : vector<8x128xf32>
    %c0_20 = arith.constant 0 : index
    %c0_21 = arith.constant 0 : index
    %24 = vector.load %arg5[%c0_20, %c0_21] : memref<128x4xf32, #tpu.memory_space<vmem>>, vector<128x4xf32>
    %cst_22 = arith.constant dense<0.000000e+00> : vector<8x4xf32>
    %25 = tpu.matmul %23, %24, %cst_22 {dimension_numbers = #tpu.dot_dimension_numbers<[1], [0], [0], [1], [0, 0, 1, 1], [], []>} : vector<8x128xf32>, vector<128x4xf32>, vector<8x4xf32> -> vector<8x4xf32>
    %c0_23 = arith.constant 0 : index
    %c0_24 = arith.constant 0 : index
    %26 = vector.load %arg6[%c0_23, %c0_24] : memref<1x4xf32, #tpu.memory_space<vmem>>, vector<1x4xf32>
    %27 = vector.broadcast %26 : vector<1x4xf32> to vector<8x4xf32>
    %28 = arith.addf %25, %27 : vector<8x4xf32>
    %c0_25 = arith.constant 0 : index
    %c0_26 = arith.constant 0 : index
    %29 = vector.load %arg7[%c0_25, %c0_26] : memref<8x4xf32, #tpu.memory_space<vmem>>, vector<8x4xf32>
    tpu.vector_store %arg7[%c0_25, %c0_26], %28 {strides = array<i32>} : memref<8x4xf32, #tpu.memory_space<vmem>>, vector<8x4xf32>,
    return
  }
}

</mosaic_0001>

<bundles_post_ra>
// kernel: fk_model_back_forward.1
= control target key start
LH: loop header
LB: loop body
LE: loop exit
PB: predicated region body
PF: predicated region fallthrough
CT: control target
= control target key end

     0   :  { %12 = vsyncpa [#allocation3], 0  ;;  %s613_s24 = smov [#allocation2]   ;;  %s791_s0 = inlined_call_operand.vmem [shape: f32[8,16], index: 0, kind: input, shape index: {}]   ;;  %s792_s1 = inlined_call_operand.vmem [shape: f32[16,128], index: 1, kind: input, shape index: {}]   ;;  %s793_s2 = inlined_call_operand.vmem [shape: f32[1,128], index: 2, kind: input, shape index: {}]   ;;  %s794_s3 = inlined_call_operand.hbm [shape: f32[2,128,128], index: 3, kind: input, shape index: {}]   ;;  %s795_s4 = inlined_call_operand.vmem [shape: f32[2,1,128], index: 4, kind: input, shape index: {}]   ;;  %s796_s5 = inlined_call_operand.vmem [shape: f32[128,4], index: 5, kind: input, shape index: {}]   ;;  %s797_s6 = inlined_call_operand.vmem [shape: f32[1,4], index: 6, kind: input, shape index: {}]   ;;  %s798_s7 = inlined_call_operand.vmem [shape: f32[8,4], index: 7, kind: output, shape index: {}]  }
   0x1   :  { %s24_s25 = sshll.u32 %s613_s24, 4  ;;  %s25_s25 = int_to_ptr.vmem [resolvable:$true] %s24_s25 }
   0x2   :  { %s599_s26 = scalar_lea.vmem %s25_s25, 4096  ;;  %p604_p1 = scmp.lt.s32.totalorder %s25_s25, %s25_s25 }
   0x3   :  { %p600_p0 = scmp.ne.s32.totalorder %s25_s25, %s599_s26  ;;  %p605_p2 = scmp.lt.s32.totalorder %s599_s26, %s599_s26 }
   0x5   :  { %p606_p3 = por %p605_p2, %p604_p1 }
   0x7   :  { %p607_p4 = pnand %p606_p3, %p600_p0 }
   0x9   :  { %610 = shalt.err (!%p607_p4)
}
   0xa   :  { %s614_s27 = smov 128   ;;  %s615_s28 = smov 8  }
   0xb   :  { %30 = dma.hbm_to_vmem [thread:$0]  %s794_s3, 4096, %s25_s25, [#allocation3], %s614_s27, %s614_s27, %s615_s28  }
   0xc   :  { %611 = dma.done.wait [#allocation3], 4096  }
   0xd   :  { %612 = vsyncadd [#allocation3], 4294963200  ;;  %v616_v0 = vmov 0.0   ;;  %vm617_vm0 = vmmov 0   ;;  %v42_v1 = vld [vmem:[%s792_s1 + $0x8] sm:$0xff]  ;;  %v41_v2 = vld [vmem:[%s792_s1] sm:$0xff] }
   0xe   :  { %474 = vmatprep.subr.mxu0 %v616_v0  ;;  %478 = vmatprep.mubr.msk.f32.mxu0 %vm617_vm0, %v616_v0  ;;  %v40_v3 = vld [vmem:[%s791_s0] sm:$0xff]  ;;  %vm50_vm1 = vcmask 130048   ;;  %v139_v4 = vld [vmem:[#allocation2 + $0x78] sm:$0xff]  ;;  %v138_v5 = vld [vmem:[#allocation2 + $0x70] sm:$0xff]  ;;  %vm407_vm2 = vcmask 31744  }
   0xf   :  { %481 = vmatprep.subr.mxu1 %v616_v0  ;;  %513 = vmatprep.mubr.msk.f32.mxu1 %vm617_vm0, %v616_v0  ;;  %v137_v6 = vld [vmem:[#allocation2 + $0x68] sm:$0xff]  ;;  %v136_v7 = vld [vmem:[#allocation2 + $0x60] sm:$0xff]  ;;  %v135_v8 = vld [vmem:[#allocation2 + $0x58] sm:$0xff] }
  0x10   :  { %475 = vmatpush3.msra.mxu0 %v42_v1  ;;  %482 = vmatpush3.msra.mxu1 %v139_v4  ;;  %v134_v9 = vld [vmem:[#allocation2 + $0x50] sm:$0xff]  ;;  %v133_v10 = vld [vmem:[#allocation2 + $0x48] sm:$0xff]  ;;  %v132_v11 = vld [vmem:[#allocation2 + $0x40] sm:$0xff] }
  0x11   :  { %476 = vmatprep.subr.mxu0 %v616_v0  ;;  %483 = vmatprep.subr.mxu1 %v616_v0  ;;  %v131_v12 = vld [vmem:[#allocation2 + $0x38] sm:$0xff]  ;;  %v130_v13 = vld [vmem:[#allocation2 + $0x30] sm:$0xff]  ;;  %v129_v14 = vld [vmem:[#allocation2 + $0x28] sm:$0xff] }
  0x12   :  { %477 = vmatpush3.msra.mxu0 %v41_v2  ;;  %484 = vmatpush3.msra.mxu1 %v138_v5  ;;  %v128_v15 = vld [vmem:[#allocation2 + $0x20] sm:$0xff]  ;;  %v127_v16 = vld [vmem:[#allocation2 + $0x18] sm:$0xff]  ;;  %v126_v17 = vld [vmem:[#allocation2 + $0x10] sm:$0xff] }
  0x13   :  { %479 = vmatmul.mubr.msk.f32.vlgmr.msra.gmra.mxu0 %vm50_vm1, %v40_v3  ;;  %485 = vmatprep.subr.mxu1 %v616_v0  ;;  %v125_v18 = vld [vmem:[#allocation2 + $0x8] sm:$0xff]  ;;  %v124_v19 = vld [vmem:[#allocation2] sm:$0xff]  ;;  %v234_v20 = vld [vmem:[#allocation2 + $0xf8] sm:$0xff] }
  0x14   :  { %516 = vmatprep.subr.mxu0 %v616_v0  ;;  %486 = vmatpush3.msra.mxu1 %v137_v6  ;;  %v233_v21 = vld [vmem:[#allocation2 + $0xf0] sm:$0xff]  ;;  %v232_v22 = vld [vmem:[#allocation2 + $0xe8] sm:$0xff]  ;;  %v231_v23 = vld [vmem:[#allocation2 + $0xe0] sm:$0xff] }
  0x15   :  { %548 = vmatprep.mubr.msk.f32.mxu0 %vm617_vm0, %v616_v0  ;;  %487 = vmatprep.subr.mxu1 %v616_v0  ;;  %v230_v24 = vld [vmem:[#allocation2 + $0xd8] sm:$0xff]  ;;  %v229_v25 = vld [vmem:[#allocation2 + $0xd0] sm:$0xff]  ;;  %v228_v26 = vld [vmem:[#allocation2 + $0xc8] sm:$0xff] }
  0x16   :  { %488 = vmatpush3.msra.mxu1 %v136_v7  ;;  %517 = vmatpush3.msra.mxu0 %v234_v20  ;;  %v227_v27 = vld [vmem:[#allocation2 + $0xc0] sm:$0xff]  ;;  %v226_v28 = vld [vmem:[#allocation2 + $0xb8] sm:$0xff]  ;;  %v225_v29 = vld [vmem:[#allocation2 + $0xb0] sm:$0xff] }
  0x17   :  { %489 = vmatprep.subr.mxu1 %v616_v0  ;;  %518 = vmatprep.subr.mxu0 %v616_v0  ;;  %v224_v30 = vld [vmem:[#allocation2 + $0xa8] sm:$0xff]  ;;  %v223_v31 = vld [vmem:[#allocation2 + $0xa0] sm:$0xff]  ;;  %v222_v32 = vld [vmem:[#allocation2 + $0x98] sm:$0xff] }
  0x18   :  { %490 = vmatpush3.msra.mxu1 %v135_v8  ;;  %519 = vmatpush3.msra.mxu0 %v233_v21  ;;  %v414_v33 = vld [vmem:[%s793_s2] ss:$0 sm:$0xff]  ;;  %v221_v37 = vld [vmem:[#allocation2 + $0x90] sm:$0xff]  ;;  %v220_v38 = vld [vmem:[#allocation2 + $0x88] sm:$0xff] }
  0x19   :  { %491 = vmatprep.subr.mxu1 %v616_v0  ;;  %520 = vmatprep.subr.mxu0 %v616_v0  ;;  %v219_v39 = vld [vmem:[#allocation2 + $0x80] sm:$0xff]  ;;  %v329_v40 = vld [vmem:[%s796_s5 + $0x78] sm:$0xff]  ;;  %v328_v41 = vld [vmem:[%s796_s5 + $0x70] sm:$0xff] }
  0x1a   :  { %492 = vmatpush3.msra.mxu1 %v134_v9  ;;  %521 = vmatpush3.msra.mxu0 %v232_v22  ;;  %v327_v42 = vld [vmem:[%s796_s5 + $0x68] sm:$0xff]  ;;  %v326_v43 = vld [vmem:[%s796_s5 + $0x60] sm:$0xff]  ;;  %v325_v44 = vld [vmem:[%s796_s5 + $0x58] sm:$0xff] }
  0x1b   :  { %493 = vmatprep.subr.mxu1 %v616_v0  ;;  %522 = vmatprep.subr.mxu0 %v616_v0  ;;  %v324_v45 = vld [vmem:[%s796_s5 + $0x50] sm:$0xff]  ;;  %v323_v46 = vld [vmem:[%s796_s5 + $0x48] sm:$0xff]  ;;  %v322_v47 = vld [vmem:[%s796_s5 + $0x40] sm:$0xff] }
  0x1c   :  { %494 = vmatpush3.msra.mxu1 %v133_v10  ;;  %523 = vmatpush3.msra.mxu0 %v231_v23  ;;  %v321_v48 = vld [vmem:[%s796_s5 + $0x38] sm:$0xff]  ;;  %v320_v49 = vld [vmem:[%s796_s5 + $0x30] sm:$0xff]  ;;  %v319_v50 = vld [vmem:[%s796_s5 + $0x28] sm:$0xff] }
  0x1d   :  { %495 = vmatprep.subr.mxu1 %v616_v0  ;;  %524 = vmatprep.subr.mxu0 %v616_v0  ;;  %v318_v51 = vld [vmem:[%s796_s5 + $0x20] sm:$0xff]  ;;  %v317_v52 = vld [vmem:[%s796_s5 + $0x18] sm:$0xff]  ;;  %v316_v58 = vld [vmem:[%s796_s5 + $0x10] sm:$0xff] }
  0x1e   :  { %496 = vmatpush3.msra.mxu1 %v132_v11  ;;  %525 = vmatpush3.msra.mxu0 %v230_v24  ;;  %v416_v53 = vld [vmem:[%s795_s4] ss:$0 sm:$0xff]  ;;  %v315_v59 = vld [vmem:[%s796_s5 + $0x8] sm:$0xff]  ;;  %v418_v61 = vld [vmem:[%s795_s4 + $0x1] ss:$0 sm:$0xff] }
  0x1f   :  { %497 = vmatprep.subr.mxu1 %v616_v0  ;;  %526 = vmatprep.subr.mxu0 %v616_v0  ;;  %v314_v60 = vld [vmem:[%s796_s5] sm:$0xff] }
  0x20   :  { %498 = vmatpush3.msra.mxu1 %v131_v12  ;;  %527 = vmatpush3.msra.mxu0 %v229_v25  ;;  %v419_v3 = vld [vmem:[%s797_s6] ss:$0 sm:$0xff] }
  0x21   :  { %499 = vmatprep.subr.mxu1 %v616_v0  ;;  %528 = vmatprep.subr.mxu0 %v616_v0 }
  0x22   :  { %500 = vmatpush3.msra.mxu1 %v130_v13  ;;  %529 = vmatpush3.msra.mxu0 %v228_v26 }
  0x23   :  { %501 = vmatprep.subr.mxu1 %v616_v0  ;;  %530 = vmatprep.subr.mxu0 %v616_v0 }
  0x24   :  { %502 = vmatpush3.msra.mxu1 %v129_v14  ;;  %531 = vmatpush3.msra.mxu0 %v227_v27 }
  0x25   :  { %503 = vmatprep.subr.mxu1 %v616_v0  ;;  %532 = vmatprep.subr.mxu0 %v616_v0 }
  0x26   :  { %504 = vmatpush3.msra.mxu1 %v128_v15  ;;  %533 = vmatpush3.msra.mxu0 %v226_v28 }
  0x27   :  { %505 = vmatprep.subr.mxu1 %v616_v0  ;;  %534 = vmatprep.subr.mxu0 %v616_v0 }
  0x28   :  { %506 = vmatpush3.msra.mxu1 %v127_v16  ;;  %535 = vmatpush3.msra.mxu0 %v225_v29 }
  0x29   :  { %507 = vmatprep.subr.mxu1 %v616_v0  ;;  %536 = vmatprep.subr.mxu0 %v616_v0 }
  0x2a   :  { %508 = vmatpush3.msra.mxu1 %v126_v17  ;;  %537 = vmatpush3.msra.mxu0 %v224_v30 }
  0x2b   :  { %509 = vmatprep.subr.mxu1 %v616_v0  ;;  %538 = vmatprep.subr.mxu0 %v616_v0 }
  0x2c   :  { %510 = vmatpush3.msra.mxu1 %v125_v18  ;;  %539 = vmatpush3.msra.mxu0 %v223_v31 }
  0x2d   :  { %511 = vmatprep.subr.mxu1 %v616_v0  ;;  %540 = vmatprep.subr.mxu0 %v616_v0 }
  0x2e   :  { %512 = vmatpush3.msra.mxu1 %v124_v19  ;;  %541 = vmatpush3.msra.mxu0 %v222_v32 }
  0x2f   :  { %551 = vmatprep.subr.mxu1 %v616_v0  ;;  %542 = vmatprep.subr.mxu0 %v616_v0 }
  0x30   :  { %543 = vmatpush3.msra.mxu0 %v221_v37 }
  0x31   :  { %544 = vmatprep.subr.mxu0 %v616_v0 }
  0x32   :  { %545 = vmatpush3.msra.mxu0 %v220_v38 }
  0x33   :  { %546 = vmatprep.subr.mxu0 %v616_v0 }
  0x34   :  { %547 = vmatpush3.msra.mxu0 %v219_v39 }
  0xd3   :  { %v120_v34 = vpop.f32.mrf.mxu0 }
  0xd4   :  { %v121_v35 = vadd.f32 %v414_v33, %v120_v34 }
  0xd5   :  { %v480_v36 = vpop.f32.mrf.mxu0 }
  0xd6   :  { %514 = vmatmul.mubr.f32.vlgmr.msra.gmra.mxu1 %v121_v35 }
  0xd7   :  { %583 = vmatprep.mubr.msk.f32.mxu1 %vm617_vm0, %v616_v0  ;;  %552 = vmatpush3.msra.mxu1 %v329_v40 }
  0xd8   :  { %553 = vmatprep.subr.mxu1 %v616_v0 }
  0xd9   :  { %554 = vmatpush3.msra.mxu1 %v328_v41 }
  0xda   :  { %555 = vmatprep.subr.mxu1 %v616_v0 }
  0xdb   :  { %556 = vmatpush3.msra.mxu1 %v327_v42 }
  0xdc   :  { %557 = vmatprep.subr.mxu1 %v616_v0 }
  0xdd   :  { %558 = vmatpush3.msra.mxu1 %v326_v43 }
  0xde   :  { %559 = vmatprep.subr.mxu1 %v616_v0 }
  0xdf   :  { %560 = vmatpush3.msra.mxu1 %v325_v44 }
  0xe0   :  { %561 = vmatprep.subr.mxu1 %v616_v0 }
  0xe1   :  { %562 = vmatpush3.msra.mxu1 %v324_v45 }
  0xe2   :  { %563 = vmatprep.subr.mxu1 %v616_v0 }
  0xe3   :  { %564 = vmatpush3.msra.mxu1 %v323_v46 }
  0xe4   :  { %565 = vmatprep.subr.mxu1 %v616_v0 }
  0xe5   :  { %566 = vmatpush3.msra.mxu1 %v322_v47 }
  0xe6   :  { %567 = vmatprep.subr.mxu1 %v616_v0 }
  0xe7   :  { %568 = vmatpush3.msra.mxu1 %v321_v48 }
  0xe8   :  { %569 = vmatprep.subr.mxu1 %v616_v0 }
  0xe9   :  { %570 = vmatpush3.msra.mxu1 %v320_v49 }
  0xea   :  { %571 = vmatprep.subr.mxu1 %v616_v0 }
  0xeb   :  { %572 = vmatpush3.msra.mxu1 %v319_v50 }
  0xec   :  { %573 = vmatprep.subr.mxu1 %v616_v0 }
  0xed   :  { %574 = vmatpush3.msra.mxu1 %v318_v51 }
  0xee   :  { %575 = vmatprep.subr.mxu1 %v616_v0 }
  0xef   :  { %576 = vmatpush3.msra.mxu1 %v317_v52 }
  0xf0   :  { %577 = vmatprep.subr.mxu1 %v616_v0 }
  0xf1   :  { %578 = vmatpush3.msra.mxu1 %v316_v58 }
  0xf2   :  { %579 = vmatprep.subr.mxu1 %v616_v0 }
  0xf3   :  { %580 = vmatpush3.msra.mxu1 %v315_v59 }
  0xf4   :  { %581 = vmatprep.subr.mxu1 %v616_v0 }
  0xf5   :  { %582 = vmatpush3.msra.mxu1 %v314_v60 }
 0x196   :  { %v213_v54 = vpop.f32.mrf.mxu1 }
 0x197   :  { %v214_v55 = vadd.f32 %v416_v53, %v213_v54 }
 0x198   :  { %v515_v56 = vpop.f32.mrf.mxu1 }
 0x199   :  { %v217_v57 = vmax.f32 %v214_v55, 0.0 }
 0x19b   :  { %549 = vmatmul.mubr.f32.vlgmr.msra.gmra.mxu0 %v217_v57 }
 0x25b   :  { %v309_v62 = vpop.f32.mrf.mxu0 }
 0x25c   :  { %v310_v63 = vadd.f32 %v418_v61, %v309_v62 }
 0x25d   :  { %v550_v1 = vpop.f32.mrf.mxu0 }
 0x25e   :  { %v313_v2 = vmax.f32 %v310_v63, 0.0 }
 0x260   :  { %584 = vmatmul.mubr.f32.vlgmr.msra.gmra.mxu1 %v313_v2 }
 0x320   :  { %v403_v4 = vpop.f32.mrf.mxu1 }
 0x321   :  { %v404_v0 = vadd.f32 %v419_v3, %v403_v4 }
 0x322   :  { %v585_v5 = vpop.f32.mrf.mxu1 }
 0x323   :  { %408 = vst.msk [vmem:[%s798_s7] sm:$0xff] %vm407_vm2, %v404_v0 }
 0x324   :  { %413 = vsyncpa [#allocation3], 1 }

</bundles_post_ra>
